<compile_context>
chip_gen: v5e
topology: v5e:2x2
jax: 0.10.0
libtpu: 0.0.40
codegen_flags: <defaults>
</compile_context>

<pallas_src>
import jax
import jax.numpy as jnp
from jax.experimental import pallas as pl
from jax.experimental.pallas import tpu as pltpu


def _class_token_kernel(ct_ref, x_ref, o_ref):
    # ct_ref: (1, 1, H)          learned class token (resident: constant index_map)
    # x_ref : (tile_b, S, H)     input tokens for this batch tile
    # o_ref : (tile_b, S+1, H)   output tokens for this batch tile
    tile_b = o_ref.shape[0]
    H = o_ref.shape[2]
    # Row 0 of every batch element in the tile = class token (broadcast over batch).
    o_ref[:, 0:1, :] = jnp.broadcast_to(ct_ref[...], (tile_b, 1, H))
    # Rows 1..S = the input sequence, copied through unchanged.
    # NOTE: this store is sublane-misaligned by +1 row; it remains HBM-bound at
    # these tile sizes (the XLU realignment rides in otherwise-idle slots).
    o_ref[:, 1:, :] = x_ref[...]


def _pick_tile_b(B, S, H, itemsize, budget_bytes):
    """Largest divisor of B whose double-buffered in+out slabs fit `budget_bytes`,
    while keeping the grid length >= 2 (megacore) whenever B >= 2."""
    best = 1
    for t in range(1, B + 1):
        if B % t != 0:
            continue
        if B >= 2 and (B // t) < 2:
            continue  # keep >= 2 grid steps so both v7x TensorCores get work
        # 2x double-buffer * (input (t,S,H) + output (t,S+1,H))
        need = 2 * t * (2 * S + 1) * H * itemsize
        if need <= budget_bytes:
            best = t
    return best


def class_token_forward(x, ct, *, tile_b=None, vmem_budget_bytes=24 * 1024 * 1024):
    """x: (B, S, H); ct: (1, 1, H). Returns (B, S+1, H) == cat([ct.expand(B,-1,-1), x], dim=1)."""
    B, S, H = x.shape
    assert ct.shape == (1, 1, H), "class token must have shape (1, 1, hidden_dim)"

    # Cast the (tiny) class token once in the wrapper so the kernel does no casts.
    ct = ct.astype(x.dtype)

    itemsize = jnp.dtype(x.dtype).itemsize
    if tile_b is None:
        tile_b = _pick_tile_b(B, S, H, itemsize, vmem_budget_bytes)
    assert B % tile_b == 0, "batch must be divisible by tile_b (auto-pick guarantees this)"
    grid = (B // tile_b,)

    # Double-buffered in+out VMEM need for the chosen tile (class token is ~KBs).
    vmem_need = 2 * tile_b * (2 * S + 1) * H * itemsize + H * itemsize
    compiler_kwargs = dict(dimension_semantics=("parallel",))
    if vmem_need > 14 * 1024 * 1024:
        # v5e's scoped default is only 16 MiB; raise it, but stay well under
        # v7x's 64 MiB physical VMEM.
        compiler_kwargs["vmem_limit_bytes"] = 32 * 1024 * 1024

    bytes_accessed = (B * S * H + B * (S + 1) * H + H) * itemsize

    return pl.pallas_call(
        _class_token_kernel,
        out_shape=jax.ShapeDtypeStruct((B, S + 1, H), x.dtype),
        grid=grid,
        in_specs=[
            # Constant-index block: class token stays resident across the grid.
            pl.BlockSpec((1, 1, H), lambda b: (0, 0, 0)),
            # Full (S, H) slab per batch tile (last two dims == full array dims,
            # so any S/H is legal and the block is lane-dense).
            pl.BlockSpec((tile_b, S, H), lambda b: (b, 0, 0)),
        ],
        out_specs=pl.BlockSpec((tile_b, S + 1, H), lambda b: (b, 0, 0)),
        compiler_params=pltpu.CompilerParams(**compiler_kwargs),
        cost_estimate=pl.CostEstimate(
            flops=0, transcendentals=0, bytes_accessed=bytes_accessed),
    )(ct, x)


def _reference(x, ct):
    n = x.shape[0]
    batch_class_token = jnp.broadcast_to(ct.astype(x.dtype), (n, 1, x.shape[2]))
    return jnp.concatenate([batch_class_token, x], axis=1)


if __name__ == "__main__":
    key = jax.random.PRNGKey(0)
    kx, kc = jax.random.split(key, 2)

    # Small smoke test (tile_b auto-picks 1 here since B=2 must keep grid >= 2).
    B, S, H = 2, 8, 128
    x = jax.random.normal(kx, (B, S, H), dtype=jnp.float32)
    # PyTorch initializes the class token to zeros; use a random one so the
    # correctness check is non-trivial.
    ct = 0.02 * jax.random.normal(kc, (1, 1, H), dtype=jnp.float32)
    out = jax.block_until_ready(class_token_forward(x, ct))
    ref = _reference(x, ct)
    assert out.shape == (B, S + 1, H)
    assert jnp.array_equal(out, ref), "mismatch vs reference (small config)"

    # Second config exercising the multi-batch tile path (auto tile_b = 4 here).
    B2, S2, H2 = 8, 16, 256
    x2 = jax.random.normal(kx, (B2, S2, H2), dtype=jnp.float32)
    ct2 = 0.02 * jax.random.normal(kc, (1, 1, H2), dtype=jnp.float32)
    out2 = jax.block_until_ready(class_token_forward(x2, ct2))
    ref2 = _reference(x2, ct2)
    assert out2.shape == (B2, S2 + 1, H2)
    assert jnp.array_equal(out2, ref2), "mismatch vs reference (tiled config)"

    print("KERNEL_OK")
</pallas_src>

<mosaic_0001>
module attributes {stable_mosaic.version = 11 : i64} {
  func.func @_class_token_kernel(%arg0: i32, %arg1: memref<1x1x128xf32, #tpu.memory_space<vmem>>, %arg2: memref<1x8x128xf32, #tpu.memory_space<vmem>>, %arg3: memref<1x9x128xf32, #tpu.memory_space<vmem>>) attributes {dimension_semantics = [#tpu.dimension_semantics<parallel>], iteration_bounds = array<i64: 2>, scalar_prefetch = 0 : i64, scratch_operands = 0 : i64, tpu.core_type = #tpu.core_type<tc>, window_params = [{pipeline_mode = #tpu.pipeline_mode<synchronous>, transform_indices = @transform_0, window_bounds = array<i64: 1, 1, 128>}, {transform_indices = @transform_1, window_bounds = array<i64: 1, 8, 128>}, {transform_indices = @transform_2, window_bounds = array<i64: 1, 9, 128>}]} {
    %c0 = arith.constant 0 : index
    %c0_0 = arith.constant 0 : index
    %c0_1 = arith.constant 0 : index
    %0 = vector.load %arg1[%c0, %c0_0, %c0_1] : memref<1x1x128xf32, #tpu.memory_space<vmem>>, vector<1x1x128xf32>
    %c0_2 = arith.constant 0 : index
    %c0_3 = arith.constant 0 : index
    %c0_4 = arith.constant 0 : index
    %1 = vector.load %arg3[%c0_2, %c0_3, %c0_4] : memref<1x9x128xf32, #tpu.memory_space<vmem>>, vector<1x1x128xf32>
    tpu.vector_store %arg3[%c0_2, %c0_3, %c0_4], %0 {strides = array<i32>} : memref<1x9x128xf32, #tpu.memory_space<vmem>>, vector<1x1x128xf32>,
    %c0_5 = arith.constant 0 : index
    %c0_6 = arith.constant 0 : index
    %c0_7 = arith.constant 0 : index
    %2 = vector.load %arg2[%c0_5, %c0_6, %c0_7] : memref<1x8x128xf32, #tpu.memory_space<vmem>>, vector<1x8x128xf32>
    %c0_8 = arith.constant 0 : index
    %c1 = arith.constant 1 : index
    %c0_9 = arith.constant 0 : index
    %3 = vector.load %arg3[%c0_8, %c1, %c0_9] : memref<1x9x128xf32, #tpu.memory_space<vmem>>, vector<1x8x128xf32>
    tpu.vector_store %arg3[%c0_8, %c1, %c0_9], %2 {strides = array<i32>} : memref<1x9x128xf32, #tpu.memory_space<vmem>>, vector<1x8x128xf32>,
    return
  }
  func.func @transform_0(%arg0: i32) -> (i32, i32, i32) {
    %c0_i32 = arith.constant 0 : i32
    %c0_i32_0 = arith.constant 0 : i32
    %c0_i32_1 = arith.constant 0 : i32
    %c0_i32_2 = arith.constant 0 : i32
    return %c0_i32, %c0_i32_0, %c0_i32_1 : i32, i32, i32
  }
  func.func @transform_1(%arg0: i32) -> (i32, i32, i32) {
    %c0_i32 = arith.constant 0 : i32
    %c0_i32_0 = arith.constant 0 : i32
    %c0_i32_1 = arith.constant 0 : i32
    return %arg0, %c0_i32, %c0_i32_0 : i32, i32, i32
  }
  func.func @transform_2(%arg0: i32) -> (i32, i32, i32) {
    %c0_i32 = arith.constant 0 : i32
    %c0_i32_0 = arith.constant 0 : i32
    %c0_i32_1 = arith.constant 0 : i32
    return %arg0, %c0_i32, %c0_i32_0 : i32, i32, i32
  }
}

</mosaic_0001>

<bundles_post_ra>
// kernel: tpu_custom_call.1
= control target key start
LH: loop header
LB: loop body
LE: loop exit
PB: predicated region body
PF: predicated region fallthrough
CT: control target
= control target key end

     0   :  { %7 = vsyncpa [#allocation3], 0  ;;  %s544_s0 = inlined_call_operand.hbm [shape: f32[1,1,128], index: 0, kind: input, shape index: {}]   ;;  %s545_s1 = inlined_call_operand.hbm [shape: f32[2,8,128], index: 1, kind: input, shape index: {}]   ;;  %s546_s2 = inlined_call_operand.vmem [shape: f32[2,9,128], index: 2, kind: output, shape index: {}]  }
   0x1   :  { %8 = vsyncpa [#allocation5], 0 }
   0x2   :  { %10 = vsyncpa [#allocation5 + $0x1], 0  ;;  %s441_s9 = smov 0   ;;  %s443_s10 = smov 0  }
   0x3   :  { %s445_s11 = smov 0   ;;  %s447_s12 = smov 0  }
   0x4 LB: > { %s460_s13 = sadd.s32 4294967295, %s423_s12   ;;  %p57_p0 = scmp.ne.s32.totalorder %s415_s10, %s411_s9  ;;  %s423_s12 = sphi %s447_s12, %s553_s12   ;;  %s419_s11 = sphi %s445_s11, %s552_s11   ;;  %s415_s10 = sphi %s443_s10, %s551_s10   ;;  %s411_s9 = sphi %s441_s9, %s550_s9  }
   0x5   : > { %p58_p1 = scmp.eq.s32.totalorder %s460_s13, 0  ;;  %p262_p2 = scmp.ge.s32.totalorder %s423_s12, 1 }
   0x6   : > { %p94_p3 = scmp.lt.s32.totalorder %s423_s12, 3  ;;  %s106_s17 = sshll.u32 %s544_s0, 4  ;;  %s107_s17 = int_to_ptr.hbm [resolvable:$true] %s106_s17 }
   0x7   : > { %p468_p4 = por %p58_p1, %p57_p0  ;;  %s425_s19 = smov [#allocation2]  }
   0x8   : > { %p475_p5 = pnand %p262_p2, %p94_p3  ;;  %s108_s20 = sshll.u32 %s425_s19, 4  ;;  %s109_s20 = int_to_ptr.vmem [resolvable:$true] %s108_s20 }
   0x9   : > { %s484_s21 = sadd.s32 1, %s423_s12   ;;  %s44_s22 = sadd.s32 1, %s419_s11 }
   0xa   : > { %p281_p6 = pneg %p475_p5  ;;  %s41_s23 = ssub.s32 %s423_s12, %s484_s21 }
   0xb   : > { %p42_p8 = scmp.eq.s32.totalorder %s41_s23, 0  ;;  %p51_p9 = scmp.ne.s32.totalorder %s419_s11, %s415_s10 }
   0xc   : > { %p282_p7 = pnand %p281_p6, %p58_p1  ;;  %p52_p10 = scmp.eq.s32.totalorder %s423_s12, 0 }
   0xd   : > { %p290_p11 = scmp.lt.s32.totalorder %s423_s12, 2  ;;  %s119_s25 = sand.u32 1, %s419_s11  }
   0xe   : > { %284 = dma.hbm_to_vmem [thread:$0]  (!%p282_p7), %s107_s17, 16, %s109_s20, [#allocation3]  }
   0xf   : > { %s494_s24 = scalar_select %p42_p8, %s419_s11, %s44_s22  }
  0x10   : > { %p53_p12 = por %p52_p10, %p51_p9  ;;  %s265_s26 = sshll.u32 %s119_s25, 3 }
  0x11   : > { %s266_s27 = sshll.u32 %s423_s12, 3  ;;  %s123_s3 = scalar_lea.vmem [#allocation4], %s265_s26 }
  0x12   : > { %s127_s30 = scalar_lea.hbm %s545_s1, %s266_s27  ;;  %s131_s4 = sshll.u32 %s123_s3, 4  ;;  %s132_s4 = int_to_ptr.vmem [resolvable:$true] %s131_s4 }
  0x13   : > { %s129_s5 = sshll.u32 %s127_s30, 4  ;;  %p501_p13 = pnand %p290_p11, %p53_p12  ;;  %s130_s5 = int_to_ptr.hbm [resolvable:$true] %s129_s5 }
  0x14   : > { %s120_s7 = scalar_lea.sflag [#allocation5], %s119_s25  ;;  %s355_s8 = sshra.s32 %s130_s5, 4  ;;  %s356_s8 = int_to_ptr.hbm [resolvable:$true] %s355_s8 }
  0x15   : > { %s357_s9 = scalar_lea.hbm %s356_s8, 8  ;;  %p359_p2 = pneg %p501_p13 }
  0x16   : > { %p358_p0 = scmp.ne.s32.totalorder %s356_s8, %s357_s9  ;;  %s362_s16 = scalar_lea.hbm %s545_s1, 16 }
  0x17   : > { %p363_p7 = scmp.lt.s32.totalorder %s356_s8, %s545_s1  ;;  %p364_p8 = scmp.lt.s32.totalorder %s362_s16, %s357_s9 }
  0x18   : > { %p360_p3 = pnand %p359_p2, %p358_p0 }
  0x19   : > { %p365_p9 = por %p364_p8, %p363_p7 }
  0x1a   : > { %p361_p6 = pneg %p360_p3 }
  0x1c   : > { %p366_p10 = pnand %p365_p9, %p361_p6 }
  0x1e   : > { %369 = shalt.err (!%p366_p10)
}
  0x1f   : > { %288 = dma.hbm_to_vmem [thread:$0]  (!%p501_p13), %s130_s5, 128, %s132_s4, %s120_s7  }
  0x20   : > { %140 = sbr.rel (%p475_p5) target bundleno = 49 (0x31), region = 28 }
  0x25   : > { %402 = dma.done.wait (%p58_p1), [#allocation3], 16  }
  0x26   : > { %404 = vsyncadd (%p58_p1), [#allocation3], 4294967280  ;;  %s147_s20 = sand.u32 1, %s415_s10  }
  0x27   : > { %s269_s22 = sshll.u32 %s147_s20, 3  ;;  %s148_s23 = scalar_lea.sflag [#allocation5], %s147_s20 }
  0x28   : > { %s151_s25 = scalar_lea.vmem [#allocation4], %s269_s22 }
  0x29   : > { %406 = dma.done.wait (%p468_p4), %s148_s23, 128  }
  0x2a   : > { %408 = vsyncadd (%p468_p4), %s148_s23, 4294967168  ;;  %p173_p5 = scmp.lt.s32.totalorder %s460_s13, 1  ;;  %v178_v0 = vld [vmem:[#allocation2] sm:$0x1]  ;;  %v180_v1 = vld [vmem:[%s151_s25] sm:$0xff] }
  0x2c   : > { %s555_s13 = smov (!%p173_p5, %s460_s13), 1 }
  0x2d   : > { %s274_s18 = sshll.u32 %s555_s13, 4 }
  0x2e   : > { %s177_s28 = scalar_lea.vmem %s546_s2, %s274_s18 }
  0x2f   : > { %179 = vst [vmem:[%s177_s28] sm:$0x1] %v178_v0 }
  0x30   : > { %181 = vst [vmem:[%s177_s28 + $0x1] sm:$0xff] %v180_v1 }
  0x31 PF: > { %p13_p1 = scmp.ge.s32.totalorder %s484_s21, 4   ;;  %s550_s9 = smov %s415_s10 }
  0x32   : > { %s551_s10 = smov %s419_s11  ;;  %s552_s11 = smov %s494_s24 }
  0x33   : > { %s553_s12 = smov %s484_s21  ;;  %15 = sbr.rel (!%p13_p1) target bundleno = 4 (0x4), region = 73 }
  0x38   :  { %203 = vsyncpa [#allocation3], 1 }
  0x39   :  { %205 = vsyncpa [#allocation3 + $0x1], 1 }
  0x3a   :  { %206 = vsyncpa [#allocation5], 1 }
  0x3b   :  { %208 = vsyncpa [#allocation5 + $0x1], 1 }

</bundles_post_ra>
